<compile_context>
chip_gen: v5e
topology: v5e:2x2
jax: 0.10.0
libtpu: 0.0.40
codegen_flags: <defaults>
</compile_context>

<pallas_src>
import functools
import math

import jax
import jax.numpy as jnp
from jax.experimental import pallas as pl
from jax.experimental.pallas import tpu as pltpu


# ---------------------------------------------------------------------------
# Hot-path kernel: streaming batch partial sum over lane-dense (nb, L) blocks.
# grid = (n_split, steps); axis 0 "parallel" (per-core partial sums),
# axis 1 "arbitrary" (batch reduction with a resident output block).
# ---------------------------------------------------------------------------
def _batch_sum_kernel(x_ref, o_ref, *, tail):
    # x_ref: (1, nb, L) input block; o_ref: (1, 1, L) resident partial sum.
    step = pl.program_id(1)

    @pl.when(step == 0)
    def _init():
        o_ref[...] = jnp.zeros_like(o_ref)

    if tail == 0:
        # N divides evenly into blocks: single full-block accumulate path.
        o_ref[...] += jnp.sum(
            x_ref[...].astype(jnp.float32), axis=1, keepdims=True)
    else:
        last = pl.num_programs(1) - 1

        @pl.when(step != last)
        def _full():
            o_ref[...] += jnp.sum(
                x_ref[...].astype(jnp.float32), axis=1, keepdims=True)

        @pl.when(step == last)
        def _partial():
            # `tail` is a Python int -> static slice; ignores the padded
            # (undefined) rows of the final, partially out-of-bounds block.
            o_ref[...] += jnp.sum(
                x_ref[:, :tail, :].astype(jnp.float32), axis=1, keepdims=True)


# ---------------------------------------------------------------------------
# Hardware introspection helpers (trace-time; safe fallbacks everywhere).
# ---------------------------------------------------------------------------
def _tpu_info():
    try:
        return pltpu.get_tpu_info()
    except Exception:
        return None


def _vmem_capacity_bytes():
    info = _tpu_info()
    if info is not None:
        v = getattr(info, "vmem_capacity_bytes", None)
        try:
            v = int(v)
            if v > 0:
                return v
        except (TypeError, ValueError):
            pass
    return 64 * 1024 * 1024  # conservative: v7x per-TensorCore VMEM


def _num_tensorcores():
    info = _tpu_info()
    if info is not None:
        for attr in ("num_cores", "core_count", "num_tensorcores",
                     "tensor_cores_per_chip", "cores_per_chip"):
            v = getattr(info, attr, None)
            if v is None:
                continue
            try:
                v = int(v)
            except (TypeError, ValueError):
                continue
            if 1 <= v <= 8:
                return v
    try:
        kind = jax.devices()[0].device_kind.lower()
    except Exception:
        return 1
    # Devices that expose two TensorCores to a single Pallas kernel.
    if any(tag in kind for tag in ("7x", "v7", "v4", "v5p")):
        return 2
    return 1


# ---------------------------------------------------------------------------
# Forward pass.
# ---------------------------------------------------------------------------
@functools.partial(jax.jit, static_argnames=("max_ks",))
def ap_layer_forward(x, conv_w, conv_b, scale_factor, max_ks):
    """x: (N, C_in, H, W) NCHW. Returns sigmoid(conv(maxpool(mean_N(x))) * s) -> (C_out,)."""
    n, c_in, h, w = x.shape
    out_num = conv_w.shape[0]
    hp, wp = h // max_ks, w // max_ks            # MaxPool2d floor semantics
    assert conv_w.shape == (out_num, c_in, hp, wp), (
        "conv kernel must cover the whole pooled map")

    l_flat = c_in * h * w
    itemsize = x.dtype.itemsize

    # ---- phase 1: streaming batch partial sums (lane-dense 2D view) -------
    n_cores = _num_tensorcores()
    n_split = 2 if (n_cores >= 2 and n >= 2 and n % 2 == 0) else 1
    ns = n // n_split

    # VMEM sizing from physical capacity: `per_buf_budget` is for ONE logical
    # input buffer; BlockSpec double-buffers it (2x) and keeps the resident
    # (1, 1, L) output block alive as well.
    vmem_cap = _vmem_capacity_bytes()
    if vmem_cap >= 100 * 1024 * 1024:            # v5e / v6e class (128 MiB)
        per_buf_budget = 24 * 1024 * 1024
        vmem_limit = 64 * 1024 * 1024
    else:                                         # v7x class (64 MiB / TC)
        per_buf_budget = 16 * 1024 * 1024
        vmem_limit = 44 * 1024 * 1024

    l_pad = -(-l_flat // 128) * 128               # lane padding of last dim
    row_bytes = l_pad * itemsize
    nb = max(1, per_buf_budget // row_bytes)
    nb = min(ns, nb)
    if nb < ns:                                   # keep block rows sublane-aligned
        nb = min(ns, max(8, (nb // 8) * 8))
    steps = -(-ns // nb)
    tail = ns % nb                                # static; 0 => no mask code

    # Physical-VMEM check against *padded, double-buffered* block bytes.
    in_blk = (-(-nb // 8) * 8) * l_pad * itemsize
    out_blk = 8 * l_pad * 4
    needed = 2 * in_blk + 2 * out_blk + (2 << 20)   # + Mosaic scratch slack
    vmem_limit = min(max(vmem_limit, needed), int(vmem_cap * 0.9))

    x3 = x.reshape(n_split, ns, l_flat)           # free: NCHW is contiguous

    partial_sums = pl.pallas_call(
        functools.partial(_batch_sum_kernel, tail=tail),
        out_shape=jax.ShapeDtypeStruct((n_split, 1, l_flat), jnp.float32),
        grid=(n_split, steps),
        in_specs=[pl.BlockSpec((1, nb, l_flat), lambda s, i: (s, i, 0))],
        out_specs=pl.BlockSpec((1, 1, l_flat), lambda s, i: (s, 0, 0)),
        compiler_params=pltpu.CompilerParams(
            dimension_semantics=("parallel", "arbitrary"),
            vmem_limit_bytes=int(vmem_limit),
        ),
        cost_estimate=pl.CostEstimate(
            flops=n * l_flat,
            transcendentals=0,
            bytes_accessed=n * l_flat * itemsize + n_split * l_flat * 4,
        ),
    )(x3)

    # ---- tiny tail on a few KB of partial sums: plain jnp, fused by XLA ----
    xmean = jnp.sum(partial_sums, axis=(0, 1)) * (1.0 / n)        # (L,) batch mean
    xmean = xmean.reshape(c_in, h, w)[:, : hp * max_ks, : wp * max_ks]
    pooled = xmean.reshape(c_in, hp, max_ks, wp, max_ks).max(axis=(2, 4))
    logits = jnp.einsum("ocij,cij->o",
                        conv_w.astype(jnp.float32), pooled) + conv_b.astype(jnp.float32)
    # torch.squeeze((1, C_out, 1, 1)) -> (C_out,), then * scale_factor, sigmoid.
    # TODO(synk): eval-mode override (x_scale.data = channel_index[id]) is a
    # host-side buffer swap with no kernel equivalent; training-mode path only.
    return jax.nn.sigmoid(logits * scale_factor)


def _reference_forward(x, conv_w, conv_b, scale_factor, max_ks):
    """Pure-JAX reference of the PyTorch forward (training mode)."""
    xm = jnp.mean(x, axis=0, keepdims=True)                          # (1,C,H,W)
    _, c, h, w = xm.shape
    hp, wp = h // max_ks, w // max_ks
    xm = xm[:, :, : hp * max_ks, : wp * max_ks]
    xp = xm.reshape(1, c, hp, max_ks, wp, max_ks).max(axis=(3, 5))   # (1,C,hp,wp)
    out_num = conv_w.shape[0]
    logits = jnp.einsum("ncij,ocij->no", xp, conv_w) + conv_b[None]  # (1,C_out)
    return jax.nn.sigmoid(logits.reshape(out_num) * scale_factor)


if __name__ == "__main__":
    # Small shapes consistent with the module:
    #   in_num=4, out_num=8, activation_size=16, max_ks=2 -> conv kernel 8x8.
    N, C_IN, OUT_NUM = 2, 4, 8
    ACT_SIZE, MAX_KS = 16, 2
    KH = KW = ACT_SIZE // MAX_KS
    SCALE_FACTOR = 2.0

    key = jax.random.PRNGKey(0)
    kx, kw, kb = jax.random.split(key, 3)

    x = jax.random.normal(kx, (N, C_IN, ACT_SIZE, ACT_SIZE), dtype=jnp.float32)

    # kaiming_normal_(mode='fan_out', nonlinearity='relu'):
    #   std = sqrt(2 / fan_out), fan_out = out_num * kh * kw
    fan_out = OUT_NUM * KH * KW
    w_std = math.sqrt(2.0 / fan_out)
    conv_w = w_std * jax.random.normal(kw, (OUT_NUM, C_IN, KH, KW),
                                       dtype=jnp.float32)
    # default Conv2d bias init: U(-1/sqrt(fan_in), 1/sqrt(fan_in))
    fan_in = C_IN * KH * KW
    b_bound = 1.0 / math.sqrt(fan_in)
    conv_b = jax.random.uniform(kb, (OUT_NUM,), dtype=jnp.float32,
                                minval=-b_bound, maxval=b_bound)

    y = ap_layer_forward(x, conv_w, conv_b, SCALE_FACTOR, MAX_KS)
    y = jax.block_until_ready(y)

    y_ref = _reference_forward(x, conv_w, conv_b, SCALE_FACTOR, MAX_KS)
    assert y.shape == (OUT_NUM,)
    assert jnp.allclose(y, y_ref, atol=1e-5, rtol=1e-5), (y, y_ref)

    print("KERNEL_OK")
</pallas_src>

<mosaic_0001>
module attributes {stable_mosaic.version = 11 : i64} {
  func.func @_batch_sum_kernel(%arg0: i32, %arg1: i32, %arg2: memref<1x2x1024xf32, #tpu.memory_space<vmem>>, %arg3: memref<1x1x1024xf32, #tpu.memory_space<vmem>>) attributes {dimension_semantics = [#tpu.dimension_semantics<parallel>, #tpu.dimension_semantics<arbitrary>], iteration_bounds = array<i64: 1, 1>, scalar_prefetch = 0 : i64, scratch_operands = 0 : i64, tpu.core_type = #tpu.core_type<tc>, window_params = [{transform_indices = @transform_0, window_bounds = array<i64: 1, 2, 1024>}, {transform_indices = @transform_1, window_bounds = array<i64: 1, 1, 1024>}]} {
    %c0_i32 = arith.constant 0 : i32
    %0 = arith.cmpi eq, %arg1, %c0_i32 : i32
    %1 = arith.extui %0 : i1 to i32
    %c0_i32_0 = arith.constant 0 : i32
    %2 = arith.cmpi ne, %1, %c0_i32_0 : i32
    scf.if %2 {
      %cst_9 = arith.constant 0.000000e+00 : f32
      %9 = vector.broadcast %cst_9 : f32 to vector<1x1x1024xf32>
      %c0_10 = arith.constant 0 : index
      %c0_11 = arith.constant 0 : index
      %c0_12 = arith.constant 0 : index
      %10 = vector.load %arg3[%c0_10, %c0_11, %c0_12] : memref<1x1x1024xf32, #tpu.memory_space<vmem>>, vector<1x1x1024xf32>
      tpu.vector_store %arg3[%c0_10, %c0_11, %c0_12], %9 {strides = array<i32>} : memref<1x1x1024xf32, #tpu.memory_space<vmem>>, vector<1x1x1024xf32>,
    } else {
    }
    %c0 = arith.constant 0 : index
    %c0_1 = arith.constant 0 : index
    %c0_2 = arith.constant 0 : index
    %3 = vector.load %arg3[%c0, %c0_1, %c0_2] : memref<1x1x1024xf32, #tpu.memory_space<vmem>>, vector<1x1x1024xf32>
    %c0_3 = arith.constant 0 : index
    %c0_4 = arith.constant 0 : index
    %c0_5 = arith.constant 0 : index
    %4 = vector.load %arg2[%c0_3, %c0_4, %c0_5] : memref<1x2x1024xf32, #tpu.memory_space<vmem>>, vector<1x2x1024xf32>
    %cst = arith.constant dense<0.000000e+00> : vector<1x1024xf32>
    %5 = vector.multi_reduction <add>, %4, %cst [1] : vector<1x2x1024xf32> to vector<1x1024xf32>
    %6 = vector.shape_cast %5 : vector<1x1024xf32> to vector<1x1x1024xf32>
    %7 = arith.addf %3, %6 : vector<1x1x1024xf32>
    %c0_6 = arith.constant 0 : index
    %c0_7 = arith.constant 0 : index
    %c0_8 = arith.constant 0 : index
    %8 = vector.load %arg3[%c0_6, %c0_7, %c0_8] : memref<1x1x1024xf32, #tpu.memory_space<vmem>>, vector<1x1x1024xf32>
    tpu.vector_store %arg3[%c0_6, %c0_7, %c0_8], %7 {strides = array<i32>} : memref<1x1x1024xf32, #tpu.memory_space<vmem>>, vector<1x1x1024xf32>,
    return
  }
  func.func @transform_0(%arg0: i32, %arg1: i32) -> (i32, i32, i32) {
    %c0_i32 = arith.constant 0 : i32
    %c0_i32_0 = arith.constant 0 : i32
    return %arg0, %arg1, %c0_i32 : i32, i32, i32
  }
  func.func @transform_1(%arg0: i32, %arg1: i32) -> (i32, i32, i32) {
    %c0_i32 = arith.constant 0 : i32
    %c0_i32_0 = arith.constant 0 : i32
    %c0_i32_1 = arith.constant 0 : i32
    return %arg0, %c0_i32, %c0_i32_0 : i32, i32, i32
  }
}

</mosaic_0001>

<bundles_post_ra>
// kernel: ap_layer_forward.1
= control target key start
LH: loop header
LB: loop body
LE: loop exit
PB: predicated region body
PF: predicated region fallthrough
CT: control target
= control target key end

     0   :  { %vm37_vm0 = vcmask 1041408   ;;  %vm109_vm1 = vcmask 1040384   ;;  %vm111_vm2 = vcmask 1042434   ;;  %vm114_vm3 = vcmask 1044484   ;;  %s161_s0 = inlined_call_operand.vmem [shape: f32[1,2,1024], index: 0, kind: input, shape index: {}]   ;;  %s162_s1 = inlined_call_operand.vmem [shape: f32[1,1,1024], index: 1, kind: output, shape index: {}]  }
   0x1   :  { %v14_v0 = vld [vmem:[%s161_s0] sm:$0xff]  ;;  %v15_v1 = vld [vmem:[%s161_s0 + $0x8] sm:$0xff]  ;;  %vm116_vm4 = vcmask 1046534   ;;  %vm118_vm5 = vcmask 1045508   ;;  %vm120_vm6 = vcmask 1043456  }
   0x2   :  { %18 = vst [vmem:[#allocation1] ss:$4 sm:$0xff] %v14_v0 }
   0x3   :  { %20 = vst [vmem:[#allocation1 + $0x20] ss:$4 sm:$0xff] %v15_v1 }
   0x9   :  { %v21_v2 = vld.sshfl [vmem:[#allocation1] sm:$0xff pattern:$0x73625140]  ;;  %v22_v3 = vld.sshfl [vmem:[#allocation1 + $0x8] sm:$0xff pattern:$0x73625140] }
   0xa   :  { %v23_v4 = vld.sshfl [vmem:[#allocation1 + $0x10] sm:$0xff pattern:$0x73625140]  ;;  %v24_v5 = vld.sshfl [vmem:[#allocation1 + $0x18] sm:$0xff pattern:$0x73625140] }
   0xb   :  { %v25_v6 = vld.sshfl [vmem:[#allocation1 + $0x20] sm:$0xff pattern:$0x73625140]  ;;  %v26_v7 = vld.sshfl [vmem:[#allocation1 + $0x28] sm:$0xff pattern:$0x73625140] }
   0xc   :  { %v27_v8 = vld.sshfl [vmem:[#allocation1 + $0x30] sm:$0xff pattern:$0x73625140]  ;;  %v28_v9 = vld.sshfl [vmem:[#allocation1 + $0x38] sm:$0xff pattern:$0x73625140] }
   0xd   :  { %v38_v10 = vsel %vm37_vm0, %v21_v2, 0.0  ;;  %v45_v11 = vsel %vm37_vm0, %v22_v3, 0.0  ;;  %v52_v12 = vsel %vm37_vm0, %v23_v4, 0.0  ;;  %v59_v13 = vsel %vm37_vm0, %v24_v5, 0.0 }
   0xe   :  { %v39_v14 = vrot.slane %v38_v10, 4  ;;  %v46_v15 = vrot.slane %v45_v11, 4  ;;  %v53_v16 = vrot.slane %v52_v12, 4  ;;  %v60_v17 = vrot.slane %v59_v13, 4 }
   0xf   :  { %v66_v18 = vsel %vm37_vm0, %v25_v6, 0.0  ;;  %v73_v19 = vsel %vm37_vm0, %v26_v7, 0.0  ;;  %v80_v20 = vsel %vm37_vm0, %v27_v8, 0.0  ;;  %v87_v21 = vsel %vm37_vm0, %v28_v9, 0.0 }
  0x10   :  { %v40_v22 = vadd.f32 %v39_v14, %v38_v10  ;;  %v47_v23 = vadd.f32 %v46_v15, %v45_v11  ;;  %v54_v24 = vadd.f32 %v53_v16, %v52_v12  ;;  %v61_v25 = vadd.f32 %v60_v17, %v59_v13 }
  0x11   :  { %v67_v26 = vrot.slane %v66_v18, 4  ;;  %v74_v27 = vrot.slane %v73_v19, 4  ;;  %v81_v28 = vrot.slane %v80_v20, 4  ;;  %v88_v29 = vrot.slane %v87_v21, 4 }
  0x12   :  { %v41_v30 = vrot.slane %v40_v22, 2  ;;  %v48_v31 = vrot.slane %v47_v23, 2  ;;  %v55_v32 = vrot.slane %v54_v24, 2  ;;  %v62_v33 = vrot.slane %v61_v25, 2 }
  0x13   :  { %v68_v34 = vadd.f32 %v67_v26, %v66_v18  ;;  %v75_v35 = vadd.f32 %v74_v27, %v73_v19  ;;  %v82_v36 = vadd.f32 %v81_v28, %v80_v20  ;;  %v89_v37 = vadd.f32 %v88_v29, %v87_v21 }
  0x14   :  { %v42_v38 = vadd.f32 %v41_v30, %v40_v22  ;;  %v49_v39 = vadd.f32 %v48_v31, %v47_v23  ;;  %v56_v40 = vadd.f32 %v55_v32, %v54_v24  ;;  %v63_v41 = vadd.f32 %v62_v33, %v61_v25 }
  0x15   :  { %v69_v42 = vrot.slane %v68_v34, 2  ;;  %v76_v43 = vrot.slane %v75_v35, 2  ;;  %v83_v44 = vrot.slane %v82_v36, 2  ;;  %v90_v45 = vrot.slane %v89_v37, 2 }
  0x16   :  { %v43_v46 = vrot.slane %v42_v38, 1  ;;  %v50_v47 = vrot.slane %v49_v39, 1  ;;  %v57_v48 = vrot.slane %v56_v40, 1  ;;  %v64_v49 = vrot.slane %v63_v41, 1 }
  0x17   :  { %v70_v50 = vadd.f32 %v69_v42, %v68_v34  ;;  %v77_v51 = vadd.f32 %v76_v43, %v75_v35  ;;  %v84_v52 = vadd.f32 %v83_v44, %v82_v36  ;;  %v91_v53 = vadd.f32 %v90_v45, %v89_v37 }
  0x18   :  { %v51_v54 = vadd.f32 %v50_v47, %v49_v39  ;;  %v58_v55 = vadd.f32 %v57_v48, %v56_v40  ;;  %v65_v56 = vadd.f32 %v64_v49, %v63_v41  ;;  %v44_v61 = vadd.f32 %v43_v46, %v42_v38 }
  0x19   :  { %v71_v57 = vrot.slane %v70_v50, 1  ;;  %v78_v58 = vrot.slane %v77_v51, 1  ;;  %v85_v59 = vrot.slane %v84_v52, 1  ;;  %v92_v60 = vrot.slane %v91_v53, 1 }
  0x1a   :  { %v102_v62 = vrot.slane %v51_v54, 7  ;;  %v103_v63 = vrot.slane %v58_v55, 6  ;;  %v104_v0 = vrot.slane %v65_v56, 5 }
  0x1b   :  { %v72_v1 = vadd.f32 %v71_v57, %v70_v50  ;;  %v79_v2 = vadd.f32 %v78_v58, %v77_v51  ;;  %v86_v3 = vadd.f32 %v85_v59, %v84_v52  ;;  %v93_v4 = vadd.f32 %v92_v60, %v91_v53 }
  0x1c   :  { %v110_v5 = vsel %vm109_vm1, %v44_v61, %v102_v62  ;;  %v112_v6 = vsel %vm111_vm2, %v103_v63, %v104_v0 }
  0x1d   :  { %v105_v7 = vrot.slane %v72_v1, 4  ;;  %v106_v8 = vrot.slane %v79_v2, 3  ;;  %v107_v9 = vrot.slane %v86_v3, 2  ;;  %v108_v10 = vrot.slane %v93_v4, 1 }
  0x1e   :  { %v113_v11 = vsel %vm37_vm0, %v110_v5, %v112_v6 }
  0x1f   :  { %v115_v12 = vsel %vm114_vm3, %v105_v7, %v106_v8  ;;  %v117_v13 = vsel %vm116_vm4, %v107_v9, %v108_v10 }
  0x20   :  { %v119_v14 = vsel %vm118_vm5, %v115_v12, %v117_v13 }
  0x21   :  { %v121_v15 = vsel %vm120_vm6, %v113_v11, %v119_v14 }
  0x22   :  { %124 = vst [vmem:[%s162_s1] sm:$0xff] %v121_v15 }

</bundles_post_ra>
